<compile_context>
chip_gen: v5e
topology: v5e:2x2
jax: 0.10.0
libtpu: 0.0.40
codegen_flags: <defaults>
</compile_context>

<pallas_src>
import jax
import jax.numpy as jnp
from jax.experimental import pallas as pl
from jax.experimental.pallas import tpu as pltpu


def word_encoder_kernel(q_ref, len_ref, table_ref, out_ref):
    # q_ref:     VMEM (TB, L, 1) int32   token ids
    # len_ref:   VMEM (TB, 1, 1) int32   valid lengths per batch row
    # table_ref: VMEM (V, E)              embedding table (same block every step)
    # out_ref:   VMEM (TB, L, E)          this block's output
    TB, L, _ = q_ref.shape
    V, E = table_ref.shape

    q = q_ref[...]                                                # (TB, L, 1)
    vocab = jax.lax.broadcasted_iota(jnp.int32, (TB, L, V), 2)    # lane iota
    pos = jax.lax.broadcasted_iota(jnp.int32, (TB, L, 1), 1)      # sublane iota
    valid = pos < len_ref[...]                                    # (TB, L, 1)

    # One vectorized compare builds the one-hot; fold the length mask in so
    # invalid positions become all-zero rows (=> zero embedding after matmul).
    onehot = ((q == vocab) & valid).astype(table_ref.dtype)       # (TB, L, V)

    # Embedding gather on the MXU: (TB*L, V) @ (V, E) -> (TB*L, E).
    embeds = jnp.dot(onehot.reshape(TB * L, V), table_ref[...],
                     preferred_element_type=jnp.float32)
    out_ref[...] = embeds.reshape(TB, L, E).astype(out_ref.dtype)


def word_encoder(queries, query_lens, table, *, rows_per_block=None):
    """queries: (B, L) int; query_lens: (B,) int; table: (V, E) -> (B, L, E)."""
    B, L = queries.shape
    V, E = table.shape

    if rows_per_block is None:
        # Aim for an MXU M dimension of ~256 one-hot rows per step, capped at B.
        rows_per_block = min(B, max(1, pl.cdiv(256, L)))
    TB = rows_per_block
    grid = (pl.cdiv(B, TB),)

    # Wrapper-side reshapes are free layout plumbing: keep token ids in the
    # sublane dim so the in-kernel compare is a cheap lane-broadcast.
    q3 = queries.reshape(B, L, 1).astype(jnp.int32)
    lens3 = jnp.asarray(query_lens).reshape(B, 1, 1).astype(jnp.int32)

    return pl.pallas_call(
        word_encoder_kernel,
        out_shape=jax.ShapeDtypeStruct((B, L, E), table.dtype),
        grid_spec=pltpu.PrefetchScalarGridSpec(
            num_scalar_prefetch=0,
            grid=grid,
            in_specs=[
                pl.BlockSpec((TB, L, 1), lambda i: (i, 0, 0)),
                pl.BlockSpec((TB, 1, 1), lambda i: (i, 0, 0)),
                # Constant block index: Pallas does not re-fetch the table
                # across grid steps.
                pl.BlockSpec((V, E), lambda i: (0, 0)),
            ],
            out_specs=pl.BlockSpec((TB, L, E), lambda i: (i, 0, 0)),
        ),
        compiler_params=pltpu.CompilerParams(
            dimension_semantics=("parallel",)),   # rows independent -> v7x 2 TCs
    )(q3, lens3, table)


if __name__ == "__main__":
    key = jax.random.PRNGKey(0)
    B, L, V, E = 2, 8, 32, 32          # batch, query_max_len, vocab_size, embed_dim
    k_tab, k_q = jax.random.split(key)

    # Deterministic "kaiming_uniform_" init of the embedding weight:
    # fan_in = embed_dim, gain = sqrt(2), bound = sqrt(6 / fan_in).
    bound = (6.0 / E) ** 0.5
    table = jax.random.uniform(k_tab, (V, E), jnp.float32, -bound, bound)

    queries = jax.random.randint(k_q, (B, L), 0, V, dtype=jnp.int32)
    query_lens = jnp.array([5, 3], dtype=jnp.int32)

    out = jax.block_until_ready(word_encoder(queries, query_lens, table))

    # Pure-JAX reference of the PyTorch forward.
    mask = (jnp.arange(L)[None, :] < query_lens[:, None]).astype(jnp.float32)
    ref = table[queries] * mask[..., None]

    assert out.shape == (B, L, E)
    assert jnp.allclose(out, ref, atol=1e-6), "Pallas output mismatch vs reference"
    print("KERNEL_OK")
</pallas_src>

<mosaic_0001>
module attributes {stable_mosaic.version = 11 : i64} {
  func.func @word_encoder_kernel(%arg0: i32, %arg1: memref<2x8x1xi32, #tpu.memory_space<vmem>>, %arg2: memref<2x1x1xi32, #tpu.memory_space<vmem>>, %arg3: memref<32x32xf32, #tpu.memory_space<vmem>>, %arg4: memref<2x8x32xf32, #tpu.memory_space<vmem>>) attributes {dimension_semantics = [#tpu.dimension_semantics<parallel>], iteration_bounds = array<i64: 1>, scalar_prefetch = 0 : i64, scratch_operands = 0 : i64, tpu.core_type = #tpu.core_type<tc>, window_params = [{transform_indices = @transform_0, window_bounds = array<i64: 2, 8, 1>}, {transform_indices = @transform_1, window_bounds = array<i64: 2, 1, 1>}, {pipeline_mode = #tpu.pipeline_mode<synchronous>, transform_indices = @transform_2, window_bounds = array<i64: 32, 32>}, {transform_indices = @transform_3, window_bounds = array<i64: 2, 8, 32>}]} {
    %c0 = arith.constant 0 : index
    %c0_0 = arith.constant 0 : index
    %c0_1 = arith.constant 0 : index
    %0 = vector.load %arg1[%c0, %c0_0, %c0_1] : memref<2x8x1xi32, #tpu.memory_space<vmem>>, vector<2x8x1xi32>
    %1 = tpu.iota {dimensions = array<i32: 2>} : vector<2x8x32xi32>
    %2 = tpu.iota {dimensions = array<i32: 1>} : vector<2x8x1xi32>
    %c0_2 = arith.constant 0 : index
    %c0_3 = arith.constant 0 : index
    %c0_4 = arith.constant 0 : index
    %3 = vector.load %arg2[%c0_2, %c0_3, %c0_4] : memref<2x1x1xi32, #tpu.memory_space<vmem>>, vector<2x1x1xi32>
    %4 = vector.broadcast %3 : vector<2x1x1xi32> to vector<2x8x1xi32>
    %5 = arith.cmpi slt, %2, %4 : vector<2x8x1xi32>
    %6 = vector.broadcast %0 : vector<2x8x1xi32> to vector<2x8x32xi32>
    %7 = arith.cmpi eq, %6, %1 : vector<2x8x32xi32>
    %8 = vector.broadcast %5 : vector<2x8x1xi1> to vector<2x8x32xi1>
    %9 = arith.andi %7, %8 : vector<2x8x32xi1>
    %10 = arith.extui %9 : vector<2x8x32xi1> to vector<2x8x32xi32>
    %11 = arith.sitofp %10 : vector<2x8x32xi32> to vector<2x8x32xf32>
    %12 = vector.shape_cast %11 : vector<2x8x32xf32> to vector<16x32xf32>
    %c0_5 = arith.constant 0 : index
    %c0_6 = arith.constant 0 : index
    %13 = vector.load %arg3[%c0_5, %c0_6] : memref<32x32xf32, #tpu.memory_space<vmem>>, vector<32x32xf32>
    %cst = arith.constant dense<0.000000e+00> : vector<16x32xf32>
    %14 = tpu.matmul %12, %13, %cst {dimension_numbers = #tpu.dot_dimension_numbers<[1], [0], [0], [1], [0, 0, 1, 1], [], []>} : vector<16x32xf32>, vector<32x32xf32>, vector<16x32xf32> -> vector<16x32xf32>
    %15 = vector.shape_cast %14 : vector<16x32xf32> to vector<2x8x32xf32>
    %c0_7 = arith.constant 0 : index
    %c0_8 = arith.constant 0 : index
    %c0_9 = arith.constant 0 : index
    %16 = vector.load %arg4[%c0_7, %c0_8, %c0_9] : memref<2x8x32xf32, #tpu.memory_space<vmem>>, vector<2x8x32xf32>
    tpu.vector_store %arg4[%c0_7, %c0_8, %c0_9], %15 {strides = array<i32>} : memref<2x8x32xf32, #tpu.memory_space<vmem>>, vector<2x8x32xf32>,
    return
  }
  func.func @transform_0(%arg0: i32) -> (i32, i32, i32) {
    %c0_i32 = arith.constant 0 : i32
    %c0_i32_0 = arith.constant 0 : i32
    %c0_i32_1 = arith.constant 0 : i32
    return %arg0, %c0_i32, %c0_i32_0 : i32, i32, i32
  }
  func.func @transform_1(%arg0: i32) -> (i32, i32, i32) {
    %c0_i32 = arith.constant 0 : i32
    %c0_i32_0 = arith.constant 0 : i32
    %c0_i32_1 = arith.constant 0 : i32
    return %arg0, %c0_i32, %c0_i32_0 : i32, i32, i32
  }
  func.func @transform_2(%arg0: i32) -> (i32, i32) {
    %c0_i32 = arith.constant 0 : i32
    %c0_i32_0 = arith.constant 0 : i32
    %c0_i32_1 = arith.constant 0 : i32
    return %c0_i32, %c0_i32_0 : i32, i32
  }
  func.func @transform_3(%arg0: i32) -> (i32, i32, i32) {
    %c0_i32 = arith.constant 0 : i32
    %c0_i32_0 = arith.constant 0 : i32
    %c0_i32_1 = arith.constant 0 : i32
    return %arg0, %c0_i32, %c0_i32_0 : i32, i32, i32
  }
}

</mosaic_0001>

<bundles_post_ra>
// kernel: tpu_custom_call.1
= control target key start
LH: loop header
LB: loop body
LE: loop exit
PB: predicated region body
PF: predicated region fallthrough
CT: control target
= control target key end

     0   :  { %8 = vsyncpa [#allocation3], 0  ;;  %s246_s0 = inlined_call_operand.vmem [shape: s32[2,8,1], index: 0, kind: input, shape index: {}]   ;;  %s247_s1 = inlined_call_operand.vmem [shape: s32[2,1,1], index: 1, kind: input, shape index: {}]   ;;  %s248_s2 = inlined_call_operand.hbm [shape: f32[32,32], index: 2, kind: input, shape index: {}]   ;;  %s249_s3 = inlined_call_operand.hbm [shape: f32[2,8,32], index: 3, kind: output, shape index: {}]  }
   0x1   :  { %9 = vsyncpa [#allocation4], 0  ;;  %s18_s14 = sshll.u32 %s248_s2, 4  ;;  %s192_s15 = smov [#allocation2]   ;;  %s19_s14 = int_to_ptr.hbm [resolvable:$true] %s18_s14 }
   0x2   :  { %s20_s16 = sshll.u32 %s192_s15, 4  ;;  %s193_s17 = smov 128   ;;  %s21_s16 = int_to_ptr.vmem [resolvable:$true] %s20_s16 }
   0x3   :  { %s194_s18 = smov 8  }
   0x4   :  { %26 = dma.hbm_to_vmem [thread:$0]  %s19_s14, 512, %s21_s16, [#allocation3], %s193_s17, %s193_s17, %s194_s18  }
   0x5   :  { %188 = dma.done.wait [#allocation3], 512  }
   0x6   :  { %189 = vsyncadd [#allocation3], 4294966784  ;;  %v195_v0 = vmov 0   ;;  %v33_v1 = vlaneseq  ;;  %v31_v3 = vld [vmem:[%s246_s0] sm:$0xff]  ;;  %v32_v7 = vld [vmem:[%s246_s0 + $0x8] sm:$0xff]  ;;  %vm71_vm4 = vcmask 261120  }
   0x7   :  { %136 = vset.pattern.permute.xlu0 %v195_v0  ;;  %137 = vset.pattern.permute.xlu1 %v195_v0  ;;  %v138_v4 = vld [vmem:[%s247_s1] ss:$0 sm:$0xff]  ;;  %v139_v5 = vld [vmem:[%s247_s1 + $0x1] ss:$0 sm:$0xff]  ;;  %v70_v9 = vld [vmem:[#allocation2 + $0x18] sm:$0xff]  ;;  %v196_v16 = vmov 0.0  }
   0x8   :  { %v36_v2 = vshrl.u32 %v33_v1, 7  ;;  %44 = vperm.xlu0 %136, %v31_v3   ;;  %90 = vmatpush.msra.mxu0 %v70_v9  ;;  %v69_v10 = vld [vmem:[#allocation2 + $0x10] sm:$0xff]  ;;  %v68_v11 = vld [vmem:[#allocation2 + $0x8] sm:$0xff]  ;;  %v67_v12 = vld [vmem:[#allocation2] sm:$0xff]  ;;  %v34_v13 = vand.u32 127, %v33_v1  ;;  %s197_s0 = smov [#allocation5]  }
   0x9   :  { %126 = vmatpush.msra.mxu1 %v70_v9  ;;  %s107_s1 = sshll.u32 %s197_s0, 4  ;;  %s109_s28 = sshll.u32 %s249_s3, 4  ;;  %s108_s1 = int_to_ptr.vmem [resolvable:$true] %s107_s1  ;;  %s110_s28 = int_to_ptr.hbm [resolvable:$true] %s109_s28 }
   0xa   :  { %vm41_vm0 = vcmp.lt.s32.totalorder %v36_v2, %v138_v4  ;;  %vm42_vm1 = vcmp.lt.s32.totalorder %v36_v2, %v139_v5  ;;  %91 = vmatpush.msra.mxu0 %v69_v10 }
   0xb   :  { %v51_v6 = vsel %vm41_vm0, 1, %v195_v0  ;;  %v52_v8 = vsel %vm42_vm1, 1, %v195_v0  ;;  %127 = vmatpush.msra.mxu1 %v69_v10 }
   0xc   :  { %54 = vperm.xlu1 %137, %v51_v6   ;;  %92 = vmatpush.msra.mxu0 %v68_v11 }
   0xd   :  { %128 = vmatpush.msra.mxu1 %v68_v11 }
   0xe   :  { %93 = vmatpush.msra.mxu0 %v67_v12 }
   0xf   :  { %129 = vmatpush.msra.mxu1 %v67_v12 }
  0x10   :  { %47 = vperm.xlu0 %136, %v32_v7  }
  0x14   :  { %57 = vperm.xlu1 %137, %v52_v8  }
  0x7a   :  { %v45_v14 = vpop.permute.xlu0 %44 }
  0x7b   :  { %vm49_vm2 = vcmp.eq.s32.totalorder %v45_v14, %v34_v13 }
  0x7e   :  { %v55_v15 = vpop.permute.xlu1 %54 }
  0x7f   :  { %vm59_vm3 = vcmp.eq.s32.totalorder %v55_v15, 1 }
  0x80   :  { %vm61_vm5 = vmand %vm49_vm2, %vm59_vm3 }
  0x81   :  { %v122_v17 = vsel %vm61_vm5, 1.0, %v196_v16 }
  0x82   :  { %124 = vmatmul.msk.f32.vlgmr.msra.gmra.mxu0 %vm71_vm4, %v122_v17  ;;  %v48_v18 = vpop.permute.xlu0 %47 }
  0x83   :  { %vm50_vm6 = vcmp.eq.s32.totalorder %v48_v18, %v34_v13 }
  0x86   :  { %v58_v19 = vpop.permute.xlu1 %57 }
  0x87   :  { %vm60_vm7 = vcmp.eq.s32.totalorder %v58_v19, 1 }
  0x88   :  { %vm62_vm8 = vmand %vm50_vm6, %vm60_vm7 }
  0x89   :  { %v123_v20 = vsel %vm62_vm8, 1.0, %v196_v16 }
  0x8a   :  { %125 = vmatmul.msk.f32.vlgmr.msra.gmra.mxu1 %vm71_vm4, %v123_v20 }
  0xff   :  { %v95_v21 = vpop.f32.mrf.mxu0 }
 0x100   :  { %101 = vst.msk [vmem:[#allocation5] sm:$0xff] %vm71_vm4, %v95_v21 }
 0x107   :  { %v98_v22 = vpop.f32.mrf.mxu1 }
 0x108   :  { %102 = vst.msk [vmem:[#allocation5 + $0x8] sm:$0xff] %vm71_vm4, %v98_v22 }
 0x109   :  { %115 = dma.vmem_to_hbm [thread:$0]  %s108_s1, 256, %s110_s28, [#allocation4], %s193_s17, %s193_s17, %s194_s18  }
 0x10a   :  { %190 = dma.done.wait [#allocation4], 256  }
 0x10b   :  { %191 = vsyncadd [#allocation4], 4294967040 }
 0x10c   :  { %120 = vsyncpa [#allocation3], 1 }
 0x10d   :  { %121 = vsyncpa [#allocation4], 1 }

</bundles_post_ra>
